<compile_context>
chip_gen: v5e
topology: v5e:2x2
jax: 0.10.0
libtpu: 0.0.40
codegen_flags: <defaults>
</compile_context>

<pallas_src>
from functools import partial

import jax
import jax.numpy as jnp
from jax import lax
from jax.experimental import pallas as pl
from jax.experimental.pallas import tpu as pltpu

_LANE = 128


# ---------------------------------------------------------------------------
# Kernel 1: conv-as-matmul (one MXU dot per row tile) + per-tile partial
# batch-norm statistics (sum and centered sum of squares).
# ---------------------------------------------------------------------------
def conv_stats_kernel(lhs_ref, w_ref, y_ref, psum_ref, pm2_ref, *, inv_rows):
    y = jnp.dot(lhs_ref[...], w_ref[...],
                preferred_element_type=jnp.float32)        # (rt, Ccols) f32
    y_ref[...] = y.astype(y_ref.dtype)                     # bf16 intermediate

    s = jnp.sum(y, axis=0, keepdims=True)                  # (1, Ccols)
    mu = s * inv_rows
    d = y - mu
    m2 = jnp.sum(d * d, axis=0, keepdims=True)             # (1, Ccols)
    psum_ref[...] = s[None]                                # (1, 1, Ccols)
    pm2_ref[...] = m2[None]


# ---------------------------------------------------------------------------
# Kernel 2: batch-norm affine (precomputed scale/shift) + ReLU, lane-dense.
# ---------------------------------------------------------------------------
def bn_relu_kernel(y_ref, scale_ref, shift_ref, o_ref):
    y = y_ref[...].astype(jnp.float32)
    o_ref[...] = jnp.maximum(y * scale_ref[...] + shift_ref[...],
                             0.0).astype(o_ref.dtype)


def _pick_row_tile(rows, cap):
    """Largest multiple-of-8 divisor of `rows` that is <= cap (else full)."""
    best, d = 0, 8
    lim = min(rows, cap)
    while d <= lim:
        if rows % d == 0:
            best = d
        d += 8
    if best == 0:
        return rows
    if best == rows and rows >= 16 and (rows // 2) % 8 == 0:
        best = rows // 2          # keep >= 2 grid steps for megacore sharding
    return best


def _vmem_limit_bytes():
    try:
        cap = pltpu.get_tpu_info().vmem_capacity_bytes
    except Exception:  # pragma: no cover - conservative fallback
        cap = 64 * 1024 * 1024
    return int(min(max(cap // 2, 32 * 1024 * 1024), 96 * 1024 * 1024))


# ---------------------------------------------------------------------------
# Wrapper
# ---------------------------------------------------------------------------
@partial(jax.jit, static_argnames=("dilation", "eps"))
def causal_conv3d(x_ncdhw, weight, gamma, beta, *, dilation=(1, 1, 1), eps=1e-5):
    kt, kh, kw, Cin, Cout = weight.shape
    dil_t, dil_h, dil_w = dilation
    N, cx, T, H, W = x_ncdhw.shape
    assert cx == Cin
    assert ((kh - 1) * dil_h) % 2 == 0 and ((kw - 1) * dil_w) % 2 == 0, \
        "symmetric H/W padding requires even (k-1)*dilation"

    time_pad = (kt - 1) * dil_t
    hpad = (kh - 1) * dil_h // 2
    wpad = (kw - 1) * dil_w // 2

    K = kt * kh * kw * Cin
    Rtot = N * T * H * W

    # ---- channel packing: keep HBM traffic = real bytes AND lane-dense.
    if Cout % _LANE == 0:
        g, Ccols = 1, Cout
    elif _LANE % Cout == 0 and Rtot % (_LANE // Cout) == 0:
        g, Ccols = _LANE // Cout, _LANE
    else:
        g, Ccols = 1, pl.cdiv(Cout, _LANE) * _LANE         # zero-padded cols
    Rp = Rtot // g
    gK = g * K

    # ---- wrapper-side im2col (taps on the contraction axis, causal time pad
    # folded in as exact zeros).  The (Rtot, K) -> (Rp, g*K) re-pack is a free
    # row-major reshape.
    x_cl = jnp.transpose(x_ncdhw, (0, 2, 3, 4, 1)).astype(jnp.bfloat16)
    xp = jnp.pad(x_cl, ((0, 0), (time_pad, 0), (hpad, hpad), (wpad, wpad), (0, 0)))
    patches = [xp[:, dt * dil_t:dt * dil_t + T,
                  dh * dil_h:dh * dil_h + H,
                  dw * dil_w:dw * dil_w + W, :]
               for dt in range(kt) for dh in range(kh) for dw in range(kw)]
    lhs = jnp.concatenate(patches, axis=-1).reshape(Rp, gK)

    # ---- weight (K, Cout) -> (g*K, Ccols); block-diagonal when packing.
    w2 = weight.astype(jnp.float32).reshape(K, Cout)
    if g > 1:
        eye = jnp.eye(g, dtype=jnp.float32)
        wmat = (eye[:, None, :, None] * w2[None, :, None, :]).reshape(gK, Ccols)
    else:
        wmat = jnp.pad(w2, ((0, 0), (0, Ccols - Cout)))
    wmat = wmat.astype(jnp.bfloat16)

    vmem_limit = _vmem_limit_bytes()

    # ---- pass 1: conv + partial stats ------------------------------------
    rt = _pick_row_tile(Rp, 512)
    nb = Rp // rt
    conv_out, psum, pm2 = pl.pallas_call(
        partial(conv_stats_kernel, inv_rows=1.0 / rt),
        grid=(nb,),
        in_specs=[pl.BlockSpec((rt, gK), lambda i: (i, 0)),
                  pl.BlockSpec((gK, Ccols), lambda i: (0, 0))],
        out_specs=(pl.BlockSpec((rt, Ccols), lambda i: (i, 0)),
                   pl.BlockSpec((1, 1, Ccols), lambda i: (i, 0, 0)),
                   pl.BlockSpec((1, 1, Ccols), lambda i: (i, 0, 0))),
        out_shape=(jax.ShapeDtypeStruct((Rp, Ccols), jnp.bfloat16),
                   jax.ShapeDtypeStruct((nb, 1, Ccols), jnp.float32),
                   jax.ShapeDtypeStruct((nb, 1, Ccols), jnp.float32)),
        compiler_params=pltpu.CompilerParams(
            dimension_semantics=("parallel",),
            vmem_limit_bytes=vmem_limit),
    )(lhs, wmat)

    # ---- exact combine of per-tile (sum, centered M2) partials (Chan) -----
    # Each column j of a tile is a partition of channel (j % Cout_eff).
    c_eff = Ccols // g
    ps = psum[:, 0, :].reshape(nb * g, c_eff)
    pm = pm2[:, 0, :].reshape(nb * g, c_eff)
    count = nb * g * rt                                    # == Rtot
    mean = jnp.sum(ps, axis=0) / count
    part_mean = ps / rt
    m2_tot = jnp.sum(pm, axis=0) + rt * jnp.sum((part_mean - mean) ** 2, axis=0)
    var = jnp.maximum(m2_tot / count, 0.0)                 # biased (BN training)

    if g == 1:
        gamma_f = jnp.pad(gamma.astype(jnp.float32), (0, Ccols - Cout))
        beta_f = jnp.pad(beta.astype(jnp.float32), (0, Ccols - Cout))
    else:
        gamma_f = gamma.astype(jnp.float32)
        beta_f = beta.astype(jnp.float32)
    scale_c = gamma_f * lax.rsqrt(var + eps)
    shift_c = beta_f - mean * scale_c
    scale = jnp.tile(scale_c, g).reshape(1, Ccols)
    shift = jnp.tile(shift_c, g).reshape(1, Ccols)

    # ---- pass 2: BN affine + ReLU, output directly in the input dtype -----
    rt2 = _pick_row_tile(Rp, 2048)
    nb2 = Rp // rt2
    out_packed = pl.pallas_call(
        bn_relu_kernel,
        grid=(nb2,),
        in_specs=[pl.BlockSpec((rt2, Ccols), lambda i: (i, 0)),
                  pl.BlockSpec((1, Ccols), lambda i: (0, 0)),
                  pl.BlockSpec((1, Ccols), lambda i: (0, 0))],
        out_specs=pl.BlockSpec((rt2, Ccols), lambda i: (i, 0)),
        out_shape=jax.ShapeDtypeStruct((Rp, Ccols), x_ncdhw.dtype),
        compiler_params=pltpu.CompilerParams(
            dimension_semantics=("parallel",),
            vmem_limit_bytes=vmem_limit),
    )(conv_out, scale, shift)

    # ---- unpack (free row-major reshape) and restore NCDHW ----------------
    if g > 1:
        out = out_packed.reshape(N, T, H, W, Cout)
    else:
        out = out_packed.reshape(N, T, H, W, Ccols)[..., :Cout]
    return jnp.transpose(out, (0, 4, 1, 2, 3))


# ---------------------------------------------------------------------------
# Pure-JAX reference (mirrors the PyTorch forward).
# ---------------------------------------------------------------------------
def reference(x_ncdhw, weight, gamma, beta, *, dilation=(1, 1, 1), eps=1e-5):
    kt, kh, kw, Cin, Cout = weight.shape
    time_pad = (kt - 1) * dilation[0]
    height_pad = (kh - 1) * dilation[1] // 2
    width_pad = (kw - 1) * dilation[2] // 2
    w_oidhw = jnp.transpose(weight, (4, 3, 0, 1, 2))
    y = lax.conv_general_dilated(
        x_ncdhw.astype(jnp.float32), w_oidhw.astype(jnp.float32),
        window_strides=(1, 1, 1),
        padding=[(time_pad, 0), (height_pad, height_pad),
                 (width_pad, width_pad)],
        rhs_dilation=dilation,
        dimension_numbers=("NCDHW", "OIDHW", "NCDHW"))
    mean = jnp.mean(y, axis=(0, 2, 3, 4), keepdims=True)
    var = jnp.var(y, axis=(0, 2, 3, 4), keepdims=True)
    y = (y - mean) * lax.rsqrt(var + eps)
    y = y * gamma.reshape(1, -1, 1, 1, 1) + beta.reshape(1, -1, 1, 1, 1)
    return jnp.maximum(y, 0.0)


if __name__ == "__main__":
    N, Cin, Cout = 2, 4, 8
    T, H, W = 4, 8, 8
    kt, kh, kw = 2, 3, 3

    key = jax.random.PRNGKey(0)
    kx, kw_ = jax.random.split(key)
    x = jax.random.normal(kx, (N, Cin, T, H, W), dtype=jnp.float32)
    weight = jax.random.normal(kw_, (kt, kh, kw, Cin, Cout),
                               dtype=jnp.float32) * 0.1
    gamma = jnp.ones((Cout,), jnp.float32)   # BatchNorm3d default init
    beta = jnp.zeros((Cout,), jnp.float32)

    out = jax.block_until_ready(causal_conv3d(x, weight, gamma, beta))

    ref = reference(x, weight, gamma, beta)
    assert out.shape == (N, Cout, T, H, W)
    err = float(jnp.max(jnp.abs(out - ref)))
    # bf16 matmul operands + bf16 conv intermediate -> relaxed tolerance.
    assert jnp.allclose(out, ref, atol=5e-2, rtol=5e-2), f"max abs err {err}"
    print("KERNEL_OK")
</pallas_src>

<mosaic_0001>
module attributes {stable_mosaic.version = 11 : i64} {
  func.func @conv_stats_kernel(%arg0: i32, %arg1: memref<16x1152xbf16, #tpu.memory_space<vmem>>, %arg2: memref<1152x128xbf16, #tpu.memory_space<vmem>>, %arg3: memref<16x128xbf16, #tpu.memory_space<vmem>>, %arg4: memref<1x1x128xf32, #tpu.memory_space<vmem>>, %arg5: memref<1x1x128xf32, #tpu.memory_space<vmem>>) attributes {dimension_semantics = [#tpu.dimension_semantics<parallel>], iteration_bounds = array<i64: 2>, scalar_prefetch = 0 : i64, scratch_operands = 0 : i64, tpu.core_type = #tpu.core_type<tc>, window_params = [{transform_indices = @transform_0, window_bounds = array<i64: 16, 1152>}, {pipeline_mode = #tpu.pipeline_mode<synchronous>, transform_indices = @transform_1, window_bounds = array<i64: 1152, 128>}, {transform_indices = @transform_2, window_bounds = array<i64: 16, 128>}, {transform_indices = @transform_3, window_bounds = array<i64: 1, 1, 128>}, {transform_indices = @transform_4, window_bounds = array<i64: 1, 1, 128>}]} {
    %c0 = arith.constant 0 : index
    %c0_0 = arith.constant 0 : index
    %0 = vector.load %arg1[%c0, %c0_0] : memref<16x1152xbf16, #tpu.memory_space<vmem>>, vector<16x1152xbf16>
    %c0_1 = arith.constant 0 : index
    %c0_2 = arith.constant 0 : index
    %1 = vector.load %arg2[%c0_1, %c0_2] : memref<1152x128xbf16, #tpu.memory_space<vmem>>, vector<1152x128xbf16>
    %cst = arith.constant dense<0.000000e+00> : vector<16x128xf32>
    %2 = tpu.matmul %0, %1, %cst {dimension_numbers = #tpu.dot_dimension_numbers<[1], [0], [0], [1], [0, 0, 1, 1], [], []>} : vector<16x1152xbf16>, vector<1152x128xbf16>, vector<16x128xf32> -> vector<16x128xf32>
    %3 = arith.truncf %2 : vector<16x128xf32> to vector<16x128xbf16>
    %c0_3 = arith.constant 0 : index
    %c0_4 = arith.constant 0 : index
    %4 = vector.load %arg3[%c0_3, %c0_4] : memref<16x128xbf16, #tpu.memory_space<vmem>>, vector<16x128xbf16>
    tpu.vector_store %arg3[%c0_3, %c0_4], %3 {strides = array<i32>} : memref<16x128xbf16, #tpu.memory_space<vmem>>, vector<16x128xbf16>,
    %cst_5 = arith.constant dense<0.000000e+00> : vector<128xf32>
    %5 = vector.multi_reduction <add>, %2, %cst_5 [0] : vector<16x128xf32> to vector<128xf32>
    %6 = vector.shape_cast %5 : vector<128xf32> to vector<1x128xf32>
    %cst_6 = arith.constant 6.250000e-02 : f32
    %7 = vector.broadcast %cst_6 : f32 to vector<1x128xf32>
    %8 = arith.mulf %6, %7 : vector<1x128xf32>
    %9 = vector.broadcast %8 : vector<1x128xf32> to vector<16x128xf32>
    %10 = arith.subf %2, %9 : vector<16x128xf32>
    %11 = arith.mulf %10, %10 : vector<16x128xf32>
    %cst_7 = arith.constant dense<0.000000e+00> : vector<128xf32>
    %12 = vector.multi_reduction <add>, %11, %cst_7 [0] : vector<16x128xf32> to vector<128xf32>
    %13 = vector.shape_cast %12 : vector<128xf32> to vector<1x128xf32>
    %14 = vector.shape_cast %6 : vector<1x128xf32> to vector<1x1x128xf32>
    %c0_8 = arith.constant 0 : index
    %c0_9 = arith.constant 0 : index
    %c0_10 = arith.constant 0 : index
    %15 = vector.load %arg4[%c0_8, %c0_9, %c0_10] : memref<1x1x128xf32, #tpu.memory_space<vmem>>, vector<1x1x128xf32>
    tpu.vector_store %arg4[%c0_8, %c0_9, %c0_10], %14 {strides = array<i32>} : memref<1x1x128xf32, #tpu.memory_space<vmem>>, vector<1x1x128xf32>,
    %16 = vector.shape_cast %13 : vector<1x128xf32> to vector<1x1x128xf32>
    %c0_11 = arith.constant 0 : index
    %c0_12 = arith.constant 0 : index
    %c0_13 = arith.constant 0 : index
    %17 = vector.load %arg5[%c0_11, %c0_12, %c0_13] : memref<1x1x128xf32, #tpu.memory_space<vmem>>, vector<1x1x128xf32>
    tpu.vector_store %arg5[%c0_11, %c0_12, %c0_13], %16 {strides = array<i32>} : memref<1x1x128xf32, #tpu.memory_space<vmem>>, vector<1x1x128xf32>,
    return
  }
  func.func @transform_0(%arg0: i32) -> (i32, i32) {
    %c0_i32 = arith.constant 0 : i32
    %c0_i32_0 = arith.constant 0 : i32
    return %arg0, %c0_i32 : i32, i32
  }
  func.func @transform_1(%arg0: i32) -> (i32, i32) {
    %c0_i32 = arith.constant 0 : i32
    %c0_i32_0 = arith.constant 0 : i32
    %c0_i32_1 = arith.constant 0 : i32
    return %c0_i32, %c0_i32_0 : i32, i32
  }
  func.func @transform_2(%arg0: i32) -> (i32, i32) {
    %c0_i32 = arith.constant 0 : i32
    %c0_i32_0 = arith.constant 0 : i32
    return %arg0, %c0_i32 : i32, i32
  }
  func.func @transform_3(%arg0: i32) -> (i32, i32, i32) {
    %c0_i32 = arith.constant 0 : i32
    %c0_i32_0 = arith.constant 0 : i32
    %c0_i32_1 = arith.constant 0 : i32
    return %arg0, %c0_i32, %c0_i32_0 : i32, i32, i32
  }
  func.func @transform_4(%arg0: i32) -> (i32, i32, i32) {
    %c0_i32 = arith.constant 0 : i32
    %c0_i32_0 = arith.constant 0 : i32
    %c0_i32_1 = arith.constant 0 : i32
    return %arg0, %c0_i32, %c0_i32_0 : i32, i32, i32
  }
}

module attributes {stable_mosaic.version = 11 : i64} {
  func.func @bn_relu_kernel(%arg0: i32, %arg1: memref<16x128xbf16, #tpu.memory_space<vmem>>, %arg2: memref<1x128xf32, #tpu.memory_space<vmem>>, %arg3: memref<1x128xf32, #tpu.memory_space<vmem>>, %arg4: memref<16x128xf32, #tpu.memory_space<vmem>>) attributes {dimension_semantics = [#tpu.dimension_semantics<parallel>], iteration_bounds = array<i64: 2>, scalar_prefetch = 0 : i64, scratch_operands = 0 : i64, tpu.core_type = #tpu.core_type<tc>, window_params = [{transform_indices = @transform_0, window_bounds = array<i64: 16, 128>}, {pipeline_mode = #tpu.pipeline_mode<synchronous>, transform_indices = @transform_1, window_bounds = array<i64: 1, 128>}, {pipeline_mode = #tpu.pipeline_mode<synchronous>, transform_indices = @transform_2, window_bounds = array<i64: 1, 128>}, {transform_indices = @transform_3, window_bounds = array<i64: 16, 128>}]} {
    %c0 = arith.constant 0 : index
    %c0_0 = arith.constant 0 : index
    %0 = vector.load %arg1[%c0, %c0_0] : memref<16x128xbf16, #tpu.memory_space<vmem>>, vector<16x128xbf16>
    %1 = arith.extf %0 : vector<16x128xbf16> to vector<16x128xf32>
    %c0_1 = arith.constant 0 : index
    %c0_2 = arith.constant 0 : index
    %2 = vector.load %arg2[%c0_1, %c0_2] : memref<1x128xf32, #tpu.memory_space<vmem>>, vector<1x128xf32>
    %3 = vector.broadcast %2 : vector<1x128xf32> to vector<16x128xf32>
    %4 = arith.mulf %1, %3 : vector<16x128xf32>
    %c0_3 = arith.constant 0 : index
    %c0_4 = arith.constant 0 : index
    %5 = vector.load %arg3[%c0_3, %c0_4] : memref<1x128xf32, #tpu.memory_space<vmem>>, vector<1x128xf32>
    %6 = vector.broadcast %5 : vector<1x128xf32> to vector<16x128xf32>
    %7 = arith.addf %4, %6 : vector<16x128xf32>
    %cst = arith.constant 0.000000e+00 : f32
    %8 = vector.broadcast %cst : f32 to vector<16x128xf32>
    %9 = arith.maximumf %7, %8 : vector<16x128xf32>
    %c0_5 = arith.constant 0 : index
    %c0_6 = arith.constant 0 : index
    %10 = vector.load %arg4[%c0_5, %c0_6] : memref<16x128xf32, #tpu.memory_space<vmem>>, vector<16x128xf32>
    tpu.vector_store %arg4[%c0_5, %c0_6], %9 {strides = array<i32>} : memref<16x128xf32, #tpu.memory_space<vmem>>, vector<16x128xf32>,
    return
  }
  func.func @transform_0(%arg0: i32) -> (i32, i32) {
    %c0_i32 = arith.constant 0 : i32
    %c0_i32_0 = arith.constant 0 : i32
    return %arg0, %c0_i32 : i32, i32
  }
  func.func @transform_1(%arg0: i32) -> (i32, i32) {
    %c0_i32 = arith.constant 0 : i32
    %c0_i32_0 = arith.constant 0 : i32
    %c0_i32_1 = arith.constant 0 : i32
    return %c0_i32, %c0_i32_0 : i32, i32
  }
  func.func @transform_2(%arg0: i32) -> (i32, i32) {
    %c0_i32 = arith.constant 0 : i32
    %c0_i32_0 = arith.constant 0 : i32
    %c0_i32_1 = arith.constant 0 : i32
    return %c0_i32, %c0_i32_0 : i32, i32
  }
  func.func @transform_3(%arg0: i32) -> (i32, i32) {
    %c0_i32 = arith.constant 0 : i32
    %c0_i32_0 = arith.constant 0 : i32
    return %arg0, %c0_i32 : i32, i32
  }
}

</mosaic_0001>

<bundles_post_ra>
// kernel: squeeze.2
= control target key start
LH: loop header
LB: loop body
LE: loop exit
PB: predicated region body
PF: predicated region fallthrough
CT: control target
= control target key end

     0   :  { %s130_s8 = smov 120   ;;  %s131_s9 = smov 88   ;;  %vm7_vm0 = vcmask 64512   ;;  %s221_s0 = inlined_call_operand.vmem [shape: f32[2,128], index: 0, kind: input, shape index: {}]   ;;  %s222_s1 = inlined_call_operand.vmem [shape: f32[32,8], index: 1, kind: output, shape index: {}]  }
   0x1   :  { %v4_v0 = vld [vmem:[%s221_s0] sm:$0x3]  ;;  %s129_s0 = smov 104   ;;  %s132_s10 = smov 96  }
   0x2   :  { %5 = vst [vmem:[#allocation0] sm:$0x3] %v4_v0  ;;  %s133_s11 = smov 112   ;;  %s134_s12 = smov 80  }
   0x3   :  { %s135_s13 = smov 64   ;;  %s136_s14 = smov 72  }
   0x4   :  { %s137_s15 = smov 56   ;;  %s138_s16 = smov 40  }
   0x5   :  { %s139_s17 = smov 48   ;;  %s140_s18 = smov 32  }
   0x6   :  { %s141_s19 = smov 16   ;;  %s142_s20 = smov 24  }
   0x7   :  { %s143_s21 = smov 8  }
   0x9   :  { %v21_v1 = vld [vmem:[#allocation0] sm:$0x3]  }
   0xa   :  { %v9_v2 = vld [vmem:[#allocation0] sm:$0x3]   ;;  %22 = vrot.lane.b32.xlu1 %v21_v1, %s129_s0 }
   0xb   :  { %10 = vrot.lane.b32.xlu0 %v9_v2, %s130_s8  ;;  %v33_v3 = vld [vmem:[#allocation0] sm:$0x3]  }
   0xc   :  { %34 = vrot.lane.b32.xlu2 %v33_v3, %s131_s9  ;;  %v27_v4 = vld [vmem:[#allocation0] sm:$0x3]  }
   0xd   :  { %v15_v5 = vld [vmem:[#allocation0] sm:$0x3]  }
   0xe   :  { %v39_v6 = vld [vmem:[#allocation0] sm:$0x3]  }
   0xf   :  { %v51_v7 = vld [vmem:[#allocation0] sm:$0x3]  }
  0x10   :  { %v45_v8 = vld [vmem:[#allocation0] sm:$0x3]  }
  0x11   :  { %v57_v9 = vld [vmem:[#allocation0] sm:$0x3]  }
  0x12   :  { %28 = vrot.lane.b32.xlu1 %v27_v4, %s132_s10  ;;  %v69_v10 = vld [vmem:[#allocation0] sm:$0x3]  }
  0x13   :  { %16 = vrot.lane.b32.xlu0 %v15_v5, %s133_s11  ;;  %v63_v11 = vld [vmem:[#allocation0] sm:$0x3]  }
  0x14   :  { %40 = vrot.lane.b32.xlu2 %v39_v6, %s134_s12  ;;  %v75_v12 = vld [vmem:[#allocation0] sm:$0x3]  }
  0x15   :  { %v87_v13 = vld [vmem:[#allocation0] sm:$0x3]  }
  0x16   :  { %v81_v14 = vld [vmem:[#allocation0] sm:$0x3]  }
  0x17   :  { %v93_v15 = vld [vmem:[#allocation0] sm:$0x3]  }
  0x18   :  { %v6_v21 = vld [vmem:[#allocation0] sm:$0x3]  }
  0x19   :  { %8 = vst.msk [vmem:[%s222_s1] ss:$16 sm:$0x3] %vm7_vm0, %v6_v21  }
  0x1a   :  { %52 = vrot.lane.b32.xlu1 %v51_v7, %s135_s13 }
  0x1b   :  { %46 = vrot.lane.b32.xlu0 %v45_v8, %s136_s14 }
  0x1c   :  { %58 = vrot.lane.b32.xlu2 %v57_v9, %s137_s15 }
  0x22   :  { %70 = vrot.lane.b32.xlu1 %v69_v10, %s138_s16 }
  0x23   :  { %64 = vrot.lane.b32.xlu0 %v63_v11, %s139_s17 }
  0x24   :  { %76 = vrot.lane.b32.xlu2 %v75_v12, %s140_s18 }
  0x2a   :  { %88 = vrot.lane.b32.xlu1 %v87_v13, %s141_s19 }
  0x2b   :  { %82 = vrot.lane.b32.xlu0 %v81_v14, %s142_s20 }
  0x2c   :  { %94 = vrot.lane.b32.xlu2 %v93_v15, %s143_s21 }
  0x66   :  { %v35_v16 = vpop.permute.xlu2 %34  }
  0x67   :  { %103 = vst.msk [vmem:[%s222_s1 + $0x5] ss:$16 sm:$0x3] %vm7_vm0, %v35_v16  }
  0x6e   :  { %v41_v17 = vpop.permute.xlu2 %40  }
  0x6f   :  { %104 = vst.msk [vmem:[%s222_s1 + $0x6] ss:$16 sm:$0x3] %vm7_vm0, %v41_v17  }
  0x76   :  { %v59_v18 = vpop.permute.xlu2 %58  }
  0x77   :  { %107 = vst.msk [vmem:[%s222_s1 + $0x9] ss:$16 sm:$0x3] %vm7_vm0, %v59_v18  }
  0x7c   :  { %v23_v19 = vpop.permute.xlu1 %22  }
  0x7d   :  { %v11_v20 = vpop.permute.xlu0 %10   ;;  %101 = vst.msk [vmem:[%s222_s1 + $0x3] ss:$16 sm:$0x3] %vm7_vm0, %v23_v19  }
  0x7e   :  { %99 = vst.msk [vmem:[%s222_s1 + $0x1] ss:$16 sm:$0x3] %vm7_vm0, %v11_v20   ;;  %v77_v22 = vpop.permute.xlu2 %76  }
  0x7f   :  { %110 = vst.msk [vmem:[%s222_s1 + $0xc] ss:$16 sm:$0x3] %vm7_vm0, %v77_v22  }
  0x84   :  { %v29_v23 = vpop.permute.xlu1 %28  }
  0x85   :  { %v17_v24 = vpop.permute.xlu0 %16   ;;  %102 = vst.msk [vmem:[%s222_s1 + $0x4] ss:$16 sm:$0x3] %vm7_vm0, %v29_v23  }
  0x86   :  { %100 = vst.msk [vmem:[%s222_s1 + $0x2] ss:$16 sm:$0x3] %vm7_vm0, %v17_v24   ;;  %v95_v25 = vpop.permute.xlu2 %94  }
  0x87   :  { %113 = vst.msk [vmem:[%s222_s1 + $0xf] ss:$16 sm:$0x3] %vm7_vm0, %v95_v25  }
  0x8c   :  { %v53_v26 = vpop.permute.xlu1 %52  }
  0x8d   :  { %v47_v27 = vpop.permute.xlu0 %46   ;;  %106 = vst.msk [vmem:[%s222_s1 + $0x8] ss:$16 sm:$0x3] %vm7_vm0, %v53_v26  }
  0x8e   :  { %105 = vst.msk [vmem:[%s222_s1 + $0x7] ss:$16 sm:$0x3] %vm7_vm0, %v47_v27  }
  0x94   :  { %v71_v28 = vpop.permute.xlu1 %70  }
  0x95   :  { %v65_v29 = vpop.permute.xlu0 %64   ;;  %109 = vst.msk [vmem:[%s222_s1 + $0xb] ss:$16 sm:$0x3] %vm7_vm0, %v71_v28  }
  0x96   :  { %108 = vst.msk [vmem:[%s222_s1 + $0xa] ss:$16 sm:$0x3] %vm7_vm0, %v65_v29  }
  0x9c   :  { %v89_v30 = vpop.permute.xlu1 %88  }
  0x9d   :  { %v83_v31 = vpop.permute.xlu0 %82   ;;  %112 = vst.msk [vmem:[%s222_s1 + $0xe] ss:$16 sm:$0x3] %vm7_vm0, %v89_v30  }
  0x9e   :  { %111 = vst.msk [vmem:[%s222_s1 + $0xd] ss:$16 sm:$0x3] %vm7_vm0, %v83_v31  }

// kernel: tile.13
= control target key start
LH: loop header
LB: loop body
LE: loop exit
PB: predicated region body
PF: predicated region fallthrough
CT: control target
= control target key end

     0   :  { %s28_s0 = inlined_call_operand.vmem [shape: f32[8], index: 0, kind: input, shape index: {}]   ;;  %s29_s1 = inlined_call_operand.vmem [shape: f32[16,8], index: 1, kind: output, shape index: {}]  }
   0x1   :  { %v4_v0 = vld [vmem:[%s28_s0] ss:$0 sm:$0xff] }
   0x2   :  { %5 = vst [vmem:[%s29_s1] sm:$0xff] %v4_v0 }
   0x3   :  { %8 = vst [vmem:[%s29_s1 + $0x8] sm:$0xff] %v4_v0 }

// kernel: tile.14
= control target key start
LH: loop header
LB: loop body
LE: loop exit
PB: predicated region body
PF: predicated region fallthrough
CT: control target
= control target key end

     0   :  { %s131_s10 = smov 120   ;;  %s132_s11 = smov 104   ;;  %vm3_vm0 = vcmask 64512   ;;  %vm9_vm1 = vcmask 1048512   ;;  %vm15_vm2 = vcmask 982912   ;;  %vm21_vm3 = vcmask 917312   ;;  %s207_s0 = inlined_call_operand.vmem [shape: f32[16,8], index: 0, kind: input, shape index: {}]   ;;  %s208_s1 = inlined_call_operand.vmem [shape: f32[1,128], index: 1, kind: output, shape index: {}]  }
   0x1   :  { %v101_v0 = vld [vmem:[%s207_s0 + $0xf] sm:$0x1]   ;;  %v103_v1 = vld [vmem:[%s207_s0 + $0xd] sm:$0x1]   ;;  %v105_v2 = vld [vmem:[%s207_s0 + $0xb] sm:$0x1]  }
   0x2   :  { %7 = vrot.lane.b32.xlu0 %v101_v0, %s131_s10  ;;  %19 = vrot.lane.b32.xlu1 %v103_v1, %s132_s11  ;;  %s133_s14 = smov 88   ;;  %v102_v3 = vld [vmem:[%s207_s0 + $0xe] sm:$0x1]   ;;  %v104_v4 = vld [vmem:[%s207_s0 + $0xc] sm:$0x1]   ;;  %s134_s19 = smov 112  }
   0x3   :  { %31 = vrot.lane.b32.xlu2 %v105_v2, %s133_s14  ;;  %s135_s20 = smov 96   ;;  %v106_v5 = vld [vmem:[%s207_s0 + $0xa] sm:$0x1]   ;;  %s136_s23 = smov 80   ;;  %v107_v6 = vld [vmem:[%s207_s0 + $0x9] sm:$0x1]  }
   0x4   :  { %v108_v7 = vld [vmem:[%s207_s0 + $0x8] sm:$0x1]   ;;  %s137_s28 = smov 72   ;;  %s138_s29 = smov 64   ;;  %v109_v8 = vld [vmem:[%s207_s0 + $0x7] sm:$0x1]  }
   0x5   :  { %s139_s3 = smov 56   ;;  %v110_v9 = vld [vmem:[%s207_s0 + $0x6] sm:$0x1]   ;;  %v111_v10 = vld [vmem:[%s207_s0 + $0x5] sm:$0x1]   ;;  %s140_s8 = smov 48  }
   0x6   :  { %s141_s9 = smov 40   ;;  %v112_v11 = vld [vmem:[%s207_s0 + $0x4] sm:$0x1]   ;;  %s142_s12 = smov 32   ;;  %v113_v12 = vld [vmem:[%s207_s0 + $0x3] sm:$0x1]  }
   0x7   :  { %v114_v13 = vld [vmem:[%s207_s0 + $0x2] sm:$0x1]   ;;  %s143_s17 = smov 24   ;;  %s144_s18 = smov 16   ;;  %v115_v14 = vld [vmem:[%s207_s0 + $0x1] sm:$0x1]  }
   0x8   :  { %s145_s21 = smov 8   ;;  %v2_v15 = vld [vmem:[%s207_s0] sm:$0x1]   ;;  %vm27_vm4 = vcmask 851712   ;;  %vm33_vm5 = vcmask 786112   ;;  %vm39_vm6 = vcmask 720512  }
   0x9   :  { %4 = vst.msk [vmem:[#allocation0] sm:$0x1] %vm3_vm0, %v2_v15   ;;  %vm45_vm7 = vcmask 654912   ;;  %vm51_vm8 = vcmask 589312   ;;  %vm57_vm9 = vcmask 523712   ;;  %vm63_vm10 = vcmask 458112  }
   0xa   :  { %13 = vrot.lane.b32.xlu0 %v102_v3, %s134_s19  ;;  %25 = vrot.lane.b32.xlu1 %v104_v4, %s135_s20  ;;  %vm69_vm11 = vcmask 392512   ;;  %vm75_vm12 = vcmask 326912   ;;  %vm81_vm13 = vcmask 261312   ;;  %vm87_vm14 = vcmask 195712  }
   0xb   :  { %37 = vrot.lane.b32.xlu2 %v106_v5, %s136_s23  ;;  %vm93_vm15 = vcmask 130112  }
  0x12   :  { %43 = vrot.lane.b32.xlu0 %v107_v6, %s137_s28  ;;  %49 = vrot.lane.b32.xlu1 %v108_v7, %s138_s29 }
  0x13   :  { %55 = vrot.lane.b32.xlu2 %v109_v8, %s139_s3 }
  0x1a   :  { %61 = vrot.lane.b32.xlu0 %v110_v9, %s140_s8  ;;  %67 = vrot.lane.b32.xlu1 %v111_v10, %s141_s9 }
  0x1b   :  { %73 = vrot.lane.b32.xlu2 %v112_v11, %s142_s12 }
  0x22   :  { %79 = vrot.lane.b32.xlu0 %v113_v12, %s143_s17  ;;  %85 = vrot.lane.b32.xlu1 %v114_v13, %s144_s18 }
  0x23   :  { %91 = vrot.lane.b32.xlu2 %v115_v14, %s145_s21 }
  0x5d   :  { %v32_v16 = vpop.permute.xlu2 %31  }
  0x65   :  { %v38_v17 = vpop.permute.xlu2 %37  }
  0x6d   :  { %v56_v18 = vpop.permute.xlu2 %55  }
  0x74   :  { %v8_v19 = vpop.permute.xlu0 %7   ;;  %v20_v20 = vpop.permute.xlu1 %19  }
  0x75   :  { %10 = vst.msk [vmem:[#allocation0] sm:$0x1] %vm9_vm1, %v8_v19   ;;  %v74_v21 = vpop.permute.xlu2 %73  }
  0x7c   :  { %v14_v22 = vpop.permute.xlu0 %13   ;;  %v26_v23 = vpop.permute.xlu1 %25  }
  0x7d   :  { %16 = vst.msk [vmem:[#allocation0] sm:$0x1] %vm15_vm2, %v14_v22   ;;  %v92_v24 = vpop.permute.xlu2 %91  }
  0x7e   :  { %22 = vst.msk [vmem:[#allocation0] sm:$0x1] %vm21_vm3, %v20_v20  }
  0x7f   :  { %28 = vst.msk [vmem:[#allocation0] sm:$0x1] %vm27_vm4, %v26_v23  }
  0x80   :  { %34 = vst.msk [vmem:[#allocation0] sm:$0x1] %vm33_vm5, %v32_v16  }
  0x81   :  { %40 = vst.msk [vmem:[#allocation0] sm:$0x1] %vm39_vm6, %v38_v17  }
  0x84   :  { %v44_v25 = vpop.permute.xlu0 %43   ;;  %v50_v26 = vpop.permute.xlu1 %49  }
  0x85   :  { %46 = vst.msk [vmem:[#allocation0] sm:$0x1] %vm45_vm7, %v44_v25  }
  0x86   :  { %52 = vst.msk [vmem:[#allocation0] sm:$0x1] %vm51_vm8, %v50_v26  }
  0x87   :  { %58 = vst.msk [vmem:[#allocation0] sm:$0x1] %vm57_vm9, %v56_v18  }
  0x8c   :  { %v62_v27 = vpop.permute.xlu0 %61   ;;  %v68_v28 = vpop.permute.xlu1 %67  }
  0x8d   :  { %64 = vst.msk [vmem:[#allocation0] sm:$0x1] %vm63_vm10, %v62_v27  }
  0x8e   :  { %70 = vst.msk [vmem:[#allocation0] sm:$0x1] %vm69_vm11, %v68_v28  }
  0x8f   :  { %76 = vst.msk [vmem:[#allocation0] sm:$0x1] %vm75_vm12, %v74_v21  }
  0x94   :  { %v80_v29 = vpop.permute.xlu0 %79   ;;  %v86_v30 = vpop.permute.xlu1 %85  }
  0x95   :  { %82 = vst.msk [vmem:[#allocation0] sm:$0x1] %vm81_vm13, %v80_v29  }
  0x96   :  { %88 = vst.msk [vmem:[#allocation0] sm:$0x1] %vm87_vm14, %v86_v30  }
  0x97   :  { %94 = vst.msk [vmem:[#allocation0] sm:$0x1] %vm93_vm15, %v92_v24  }
  0x9e   :  { %v97_v31 = vld [vmem:[#allocation0] sm:$0x1] }
  0x9f   :  { %100 = vst [vmem:[%s208_s1] sm:$0x1] %v97_v31 }

// kernel: causal_conv3d.2
= control target key start
LH: loop header
LB: loop body
LE: loop exit
PB: predicated region body
PF: predicated region fallthrough
CT: control target
= control target key end

     0   :  { %s1573_s15 = smov 0   ;;  %s1841_s0 = inlined_call_operand.vmem [shape: bf16[32,1152], index: 0, kind: input, shape index: {}]   ;;  %s1842_s1 = inlined_call_operand.vmem [shape: bf16[1152,128], index: 1, kind: input, shape index: {}]   ;;  %s1843_s2 = inlined_call_operand.vmem [shape: bf16[32,128], index: 2, kind: output, shape index: {0}]   ;;  %s1844_s3 = inlined_call_operand.vmem [shape: f32[2,1,128], index: 3, kind: output, shape index: {1}]   ;;  %s1845_s4 = inlined_call_operand.vmem [shape: f32[2,1,128], index: 4, kind: output, shape index: {2}]  }
   0x1 LB: > { %s1579_s16 = sadd.s32 4294967295, %s1546_s15   ;;  %p1114_p0 = scmp.ge.s32.totalorder %s1546_s15, 1  ;;  %s1546_s15 = sphi %s1573_s15, %s15_s15  }
   0x2   : > { %p169_p1 = scmp.lt.s32.totalorder %s1546_s15, 3 }
   0x4   : > { %p170_p2 = pnand %p1114_p0, %p169_p1 }
   0x5   : > { %s1115_s17 = sshll.u32 (!%p170_p2), %s1579_s16, 1  ;;  %p215_p4 = scmp.lt.s32.totalorder (!%p170_p2), %s1579_s16, 1 }
   0x6   : > { %173 = sbr.rel (%p170_p2) target bundleno = 278 (0x116), region = 28  ;;  %p203_p3 = scmp.lt.s32.totalorder (!%p170_p2), %s1115_s17, 3 }
   0xb   : > { %v1461_v0 = vld [vmem:[%s1842_s1 + $0x38] sm:$0xff]  ;;  %v1460_v4 = vld [vmem:[%s1842_s1 + $0x30] sm:$0xff]  ;;  %v1459_v8 = vld [vmem:[%s1842_s1 + $0x28] sm:$0xff]  ;;  %s1847_s17 = smov (!%p203_p3, %s1115_s17), 3  ;;  %s1849_s16 = smov (!%p215_p4, %s1579_s16), 1 }
   0xc   : > { %v1477_v1 = vld [vmem:[%s1842_s1 + $0xb8] sm:$0xff]  ;;  %853 = vmatpush.bf16.msra.mxu0 %v1461_v0  ;;  %v1476_v5 = vld [vmem:[%s1842_s1 + $0xb0] sm:$0xff]  ;;  %v1475_v9 = vld [vmem:[%s1842_s1 + $0xa8] sm:$0xff]  ;;  %s1531_s19 = smul.u32 36, %s1847_s17  ;;  %s220_s12 = scalar_lea.vmem %s1845_s4, %s1849_s16 }
   0xd   : > { %v1469_v2 = vld [vmem:[%s1842_s1 + $0x78] sm:$0xff]  ;;  %881 = vmatpush.bf16.msra.mxu2 %v1477_v1  ;;  %v1468_v6 = vld [vmem:[%s1842_s1 + $0x70] sm:$0xff]  ;;  %v1467_v10 = vld [vmem:[%s1842_s1 + $0x68] sm:$0xff] }
   0xe   : > { %v1485_v3 = vld [vmem:[%s1842_s1 + $0xf8] sm:$0xff]  ;;  %867 = vmatpush.bf16.msra.mxu1 %v1469_v2  ;;  %v1484_v7 = vld [vmem:[%s1842_s1 + $0xf0] sm:$0xff]  ;;  %v1483_v11 = vld [vmem:[%s1842_s1 + $0xe8] sm:$0xff]  ;;  %s1674_s30 = scalar_lea.vmem %s1841_s0, %s1531_s19 }
   0xf   : > { %895 = vmatpush.bf16.msra.mxu3 %v1485_v3  ;;  %v1458_v12 = vld [vmem:[%s1842_s1 + $0x20] sm:$0xff]  ;;  %v1457_v16 = vld [vmem:[%s1842_s1 + $0x18] sm:$0xff]  ;;  %v1456_v20 = vld [vmem:[%s1842_s1 + $0x10] sm:$0xff] }
  0x10   : > { %854 = vmatpush.bf16.msra.mxu0 %v1460_v4  ;;  %v1474_v13 = vld [vmem:[%s1842_s1 + $0xa0] sm:$0xff]  ;;  %v1473_v17 = vld [vmem:[%s1842_s1 + $0x98] sm:$0xff]  ;;  %v1472_v21 = vld [vmem:[%s1842_s1 + $0x90] sm:$0xff] }
  0x11   : > { %882 = vmatpush.bf16.msra.mxu2 %v1476_v5  ;;  %v1466_v14 = vld [vmem:[%s1842_s1 + $0x60] sm:$0xff]  ;;  %v1465_v18 = vld [vmem:[%s1842_s1 + $0x58] sm:$0xff]  ;;  %v1464_v22 = vld [vmem:[%s1842_s1 + $0x50] sm:$0xff] }
  0x12   : > { %868 = vmatpush.bf16.msra.mxu1 %v1468_v6  ;;  %v1482_v15 = vld [vmem:[%s1842_s1 + $0xe0] sm:$0xff]  ;;  %v1481_v19 = vld [vmem:[%s1842_s1 + $0xd8] sm:$0xff]  ;;  %v1480_v23 = vld [vmem:[%s1842_s1 + $0xd0] sm:$0xff] }
  0x13   : > { %896 = vmatpush.bf16.msra.mxu3 %v1484_v7  ;;  %v1455_v24 = vld [vmem:[%s1842_s1 + $0x8] sm:$0xff]  ;;  %v1454_v28 = vld [vmem:[%s1842_s1] sm:$0xff]  ;;  %v1493_v30 = vld [vmem:[%s1842_s1 + $0x138] sm:$0xff] }
  0x14   : > { %855 = vmatpush.bf16.msra.mxu0 %v1459_v8  ;;  %v1471_v25 = vld [vmem:[%s1842_s1 + $0x88] sm:$0xff]  ;;  %v1470_v29 = vld [vmem:[%s1842_s1 + $0x80] sm:$0xff]  ;;  %v1509_v31 = vld [vmem:[%s1842_s1 + $0x1b8] sm:$0xff] }
  0x15   : > { %883 = vmatpush.bf16.msra.mxu2 %v1475_v9  ;;  %v1463_v26 = vld [vmem:[%s1842_s1 + $0x48] sm:$0xff]  ;;  %v1462_v32 = vld [vmem:[%s1842_s1 + $0x40] sm:$0xff]  ;;  %v1501_v38 = vld [vmem:[%s1842_s1 + $0x178] sm:$0xff] }
  0x16   : > { %869 = vmatpush.bf16.msra.mxu1 %v1467_v10  ;;  %v1479_v27 = vld [vmem:[%s1842_s1 + $0xc8] sm:$0xff]  ;;  %v1478_v33 = vld [vmem:[%s1842_s1 + $0xc0] sm:$0xff]  ;;  %v1517_v39 = vld [vmem:[%s1842_s1 + $0x1f8] sm:$0xff] }
  0x17   : > { %897 = vmatpush.bf16.msra.mxu3 %v1483_v11  ;;  %v1121_v34 = vld [vmem:[%s1674_s30] sm:$0xf]  ;;  %v1449_v35 = vld [vmem:[%s1674_s30 + $0x20] sm:$0xf0]  ;;  %v1129_v36 = vld [vmem:[%s1674_s30 + $0x8] sm:$0xf] }
  0x18   : > { %856 = vmatpush.bf16.msra.mxu0 %v1458_v12  ;;  %v1450_v37 = vld [vmem:[%s1674_s30 + $0x28] sm:$0xf0]  ;;  %v1445_v40 = vld [vmem:[%s1674_s30 + $0x4] sm:$0xf]  ;;  %v1123_v41 = vld [vmem:[%s1674_s30 + $0x24] sm:$0xf0]  ;;  %v1122_v44 = vor.u32 %v1449_v35, %v1121_v34 }
  0x19   : > { %884 = vmatpush.bf16.msra.mxu2 %v1474_v13  ;;  %v1446_v42 = vld [vmem:[%s1674_s30 + $0xc] sm:$0xf]  ;;  %v1131_v43 = vld [vmem:[%s1674_s30 + $0x2c] sm:$0xf0]  ;;  %v1130_v45 = vor.u32 %v1450_v37, %v1129_v36  ;;  %v1126_v48 = vor.u32 %v1445_v40, %v1123_v41  ;;  %v1490_v56 = vld [vmem:[%s1842_s1 + $0x120] sm:$0xff] }
  0x1a   : > { %870 = vmatpush.bf16.msra.mxu1 %v1466_v14  ;;  %v1492_v46 = vld [vmem:[%s1842_s1 + $0x130] sm:$0xff]  ;;  %v1134_v49 = vor.u32 %v1446_v42, %v1131_v43  ;;  %v1491_v52 = vld [vmem:[%s1842_s1 + $0x128] sm:$0xff]  ;;  %v1506_v57 = vld [vmem:[%s1842_s1 + $0x1a0] sm:$0xff] }
  0x1b   : > { %898 = vmatpush.bf16.msra.mxu3 %v1482_v15  ;;  %v1508_v47 = vld [vmem:[%s1842_s1 + $0x1b0] sm:$0xff]  ;;  %v1507_v53 = vld [vmem:[%s1842_s1 + $0x1a8] sm:$0xff]  ;;  %v1498_v58 = vld [vmem:[%s1842_s1 + $0x160] sm:$0xff] }
  0x1c   : > { %857 = vmatpush.bf16.msra.mxu0 %v1457_v16  ;;  %v1500_v50 = vld [vmem:[%s1842_s1 + $0x170] sm:$0xff]  ;;  %v1499_v54 = vld [vmem:[%s1842_s1 + $0x168] sm:$0xff]  ;;  %v1514_v59 = vld [vmem:[%s1842_s1 + $0x1e0] sm:$0xff] }
  0x1d   : > { %885 = vmatpush.bf16.msra.mxu2 %v1473_v17  ;;  %v1516_v51 = vld [vmem:[%s1842_s1 + $0x1f0] sm:$0xff]  ;;  %v1515_v55 = vld [vmem:[%s1842_s1 + $0x1e8] sm:$0xff]  ;;  %v1489_v60 = vld [vmem:[%s1842_s1 + $0x118] sm:$0xff] }
  0x1e   : > { %871 = vmatpush.bf16.msra.mxu1 %v1465_v18  ;;  %v1505_v61 = vld [vmem:[%s1842_s1 + $0x198] sm:$0xff]  ;;  %v1488_v0 = vld [vmem:[%s1842_s1 + $0x110] sm:$0xff]  ;;  %v1487_v4 = vld [vmem:[%s1842_s1 + $0x108] sm:$0xff] }
  0x1f   : > { %899 = vmatpush.bf16.msra.mxu3 %v1481_v19  ;;  %v1497_v62 = vld [vmem:[%s1842_s1 + $0x158] sm:$0xff]  ;;  %v1504_v1 = vld [vmem:[%s1842_s1 + $0x190] sm:$0xff]  ;;  %v1503_v5 = vld [vmem:[%s1842_s1 + $0x188] sm:$0xff] }
  0x20   : > { %858 = vmatpush.bf16.msra.mxu0 %v1456_v20  ;;  %v1513_v63 = vld [vmem:[%s1842_s1 + $0x1d8] sm:$0xff]  ;;  %v1496_v2 = vld [vmem:[%s1842_s1 + $0x150] sm:$0xff]  ;;  %v1495_v6 = vld [vmem:[%s1842_s1 + $0x148] sm:$0xff] }
  0x21   : > { %886 = vmatpush.bf16.msra.mxu2 %v1472_v21  ;;  %v1512_v3 = vld [vmem:[%s1842_s1 + $0x1d0] sm:$0xff]  ;;  %v1511_v7 = vld [vmem:[%s1842_s1 + $0x1c8] sm:$0xff]  ;;  %v1486_v8 = vld [vmem:[%s1842_s1 + $0x100] sm:$0xff] }
  0x22   : > { %872 = vmatpush.bf16.msra.mxu1 %v1464_v22  ;;  %v1502_v9 = vld [vmem:[%s1842_s1 + $0x180] sm:$0xff]  ;;  %v1525_v10 = vld [vmem:[%s1842_s1 + $0x238] sm:$0xff]  ;;  %v1137_v11 = vld [vmem:[%s1674_s30 + $0x10] sm:$0xf] }
  0x23   : > { %900 = vmatpush.bf16.msra.mxu3 %v1480_v23  ;;  %v1451_v12 = vld [vmem:[%s1674_s30 + $0x30] sm:$0xf0]  ;;  %v1145_v13 = vld [vmem:[%s1674_s30 + $0x18] sm:$0xf]  ;;  %v1452_v14 = vld [vmem:[%s1674_s30 + $0x38] sm:$0xf0] }
  0x24   : > { %859 = vmatpush.bf16.msra.mxu0 %v1455_v24  ;;  %v1494_v15 = vld [vmem:[%s1842_s1 + $0x140] sm:$0xff]  ;;  %v1447_v17 = vld [vmem:[%s1674_s30 + $0x14] sm:$0xf]  ;;  %v1139_v18 = vld [vmem:[%s1674_s30 + $0x34] sm:$0xf0]  ;;  %v1138_v21 = vor.u32 %v1451_v12, %v1137_v11  ;;  %v1146_v22 = vor.u32 %v1452_v14, %v1145_v13 }
  0x25   : > { %887 = vmatpush.bf16.msra.mxu2 %v1471_v25  ;;  %v1510_v16 = vld [vmem:[%s1842_s1 + $0x1c0] sm:$0xff]  ;;  %v1448_v19 = vld [vmem:[%s1674_s30 + $0x1c] sm:$0xf]  ;;  %v1142_v23 = vor.u32 %v1447_v17, %v1139_v18  ;;  %v1524_v25 = vld [vmem:[%s1842_s1 + $0x230] sm:$0xff] }
  0x26   : > { %873 = vmatpush.bf16.msra.mxu1 %v1463_v26  ;;  %v1147_v20 = vld [vmem:[%s1674_s30 + $0x3c] sm:$0xf0]  ;;  %v1523_v26 = vld [vmem:[%s1842_s1 + $0x228] sm:$0xff] }
  0x27   : > { %901 = vmatpush.bf16.msra.mxu3 %v1479_v27  ;;  %v1150_v24 = vor.u32 %v1448_v19, %v1147_v20  ;;  %v1522_v27 = vld [vmem:[%s1842_s1 + $0x220] sm:$0xff] }
  0x28   : > { %860 = vmatpush.bf16.msra.mxu0 %v1454_v28  ;;  %v1521_v28 = vld [vmem:[%s1842_s1 + $0x218] sm:$0xff] }
  0x29   : > { %888 = vmatpush.bf16.msra.mxu2 %v1470_v29  ;;  %v1520_v29 = vld [vmem:[%s1842_s1 + $0x210] sm:$0xff] }
  0x2a   : > { %874 = vmatpush.bf16.msra.mxu1 %v1462_v32  ;;  %v1153_v32 = vld [vmem:[%s1674_s30 + $0x20] sm:$0xf] }
  0x2b   : > { %902 = vmatpush.bf16.msra.mxu3 %v1478_v33  ;;  %861 = vmatmul.bf16.vlgmr.msra.gmra.mxu0 %v1122_v44  ;;  %v1453_v33 = vld [vmem:[%s1674_s30 + $0x40] sm:$0xf0]  ;;  %s1118_s30 = sshll.u32 %s1847_s17, 2  ;;  %s217_s17 = scalar_lea.vmem %s1844_s3, %s1849_s16 }
  0x2c   : > { %909 = vmatpush.bf16.msrb.mxu0 %v1493_v30  ;;  %889 = vmatmul.bf16.vlgmr.msra.gmra.mxu2 %v1130_v45  ;;  %v1519_v30 = vld [vmem:[%s1842_s1 + $0x208] sm:$0xff]  ;;  %v1154_v34 = vor.u32 %v1453_v33, %v1153_v32  ;;  %s213_s7 = scalar_lea.vmem %s1843_s2, %s1118_s30 }
  0x2d   : > { %937 = vmatpush.bf16.msrb.mxu2 %v1509_v31  ;;  %875 = vmatmul.bf16.vlgmr.msra.gmra.mxu1 %v1126_v48  ;;  %v1518_v31 = vld [vmem:[%s1842_s1 + $0x200] sm:$0xff] }
  0x2e   : > { %923 = vmatpush.bf16.msrb.mxu1 %v1501_v38  ;;  %903 = vmatmul.bf16.vlgmr.msra.gmra.mxu3 %v1134_v49 }
  0x2f   : > { %951 = vmatpush.bf16.msrb.mxu3 %v1517_v39 }
  0x30   : > { %910 = vmatpush.bf16.msrb.mxu0 %v1492_v46 }
  0x31   : > { %938 = vmatpush.bf16.msrb.mxu2 %v1508_v47 }
  0x32   : > { %924 = vmatpush.bf16.msrb.mxu1 %v1500_v50 }
  0x33   : > { %952 = vmatpush.bf16.msrb.mxu3 %v1516_v51 }
  0x34   : > { %911 = vmatpush.bf16.msrb.mxu0 %v1491_v52 }
  0x35   : > { %939 = vmatpush.bf16.msrb.mxu2 %v1507_v53 }
  0x36   : > { %925 = vmatpush.bf16.msrb.mxu1 %v1499_v54 }
  0x37   : > { %953 = vmatpush.bf16.msrb.mxu3 %v1515_v55 }
  0x38   : > { %912 = vmatpush.bf16.msrb.mxu0 %v1490_v56 }
  0x39   : > { %940 = vmatpush.bf16.msrb.mxu2 %v1506_v57 }
  0x3a   : > { %926 = vmatpush.bf16.msrb.mxu1 %v1498_v58 }
  0x3b   : > { %954 = vmatpush.bf16.msrb.mxu3 %v1514_v59 }
  0x3c   : > { %913 = vmatpush.bf16.msrb.mxu0 %v1489_v60 }
  0x3d   : > { %941 = vmatpush.bf16.msrb.mxu2 %v1505_v61 }
  0x3e   : > { %927 = vmatpush.bf16.msrb.mxu1 %v1497_v62 }
  0x3f   : > { %955 = vmatpush.bf16.msrb.mxu3 %v1513_v63 }
  0x40   : > { %914 = vmatpush.bf16.msrb.mxu0 %v1488_v0 }
  0x41   : > { %942 = vmatpush.bf16.msrb.mxu2 %v1504_v1 }
  0x42   : > { %928 = vmatpush.bf16.msrb.mxu1 %v1496_v2 }
  0x43   : > { %956 = vmatpush.bf16.msrb.mxu3 %v1512_v3 }
  0x44   : > { %915 = vmatpush.bf16.msrb.mxu0 %v1487_v4 }
  0x45   : > { %943 = vmatpush.bf16.msrb.mxu2 %v1503_v5 }
  0x46   : > { %929 = vmatpush.bf16.msrb.mxu1 %v1495_v6 }
  0x47   : > { %957 = vmatpush.bf16.msrb.mxu3 %v1511_v7 }
  0x48   : > { %916 = vmatpush.bf16.msrb.mxu0 %v1486_v8 }
  0x49   : > { %944 = vmatpush.bf16.msrb.mxu2 %v1502_v9 }
  0x4a   : > { %930 = vmatpush.bf16.msrb.mxu1 %v1494_v15 }
  0x4b   : > { %958 = vmatpush.bf16.msrb.mxu3 %v1510_v16  ;;  %917 = vmatmul.bf16.vlgmr.msrb.gmra.mxu0 %v1138_v21 }
  0x4c   : > { %965 = vmatpush.bf16.msra.mxu0 %v1525_v10  ;;  %945 = vmatmul.bf16.vlgmr.msrb.gmra.mxu2 %v1146_v22 }
  0x4d   : > { %931 = vmatmul.bf16.vlgmr.msrb.gmra.mxu1 %v1142_v23 }
  0x4e   : > { %959 = vmatmul.bf16.vlgmr.msrb.gmra.mxu3 %v1150_v24 }
  0x50   : > { %966 = vmatpush.bf16.msra.mxu0 %v1524_v25 }
  0x54   : > { %967 = vmatpush.bf16.msra.mxu0 %v1523_v26 }
  0x58   : > { %968 = vmatpush.bf16.msra.mxu0 %v1522_v27 }
  0x5c   : > { %969 = vmatpush.bf16.msra.mxu0 %v1521_v28 }
  0x60   : > { %970 = vmatpush.bf16.msra.mxu0 %v1520_v29 }
  0x64   : > { %971 = vmatpush.bf16.msra.mxu0 %v1519_v30 }
  0x68   : > { %972 = vmatpush.bf16.msra.mxu0 %v1518_v31 }
  0x6b   : > { %973 = vmatmul.bf16.vlgmr.msra.gmra.mxu0 %v1154_v34 }
  0xa8   : > { %v862_v35 = vpop.f32.mrf.mxu0 }
  0xaa   : > { %v876_v36 = vpop.f32.mrf.mxu1 }
  0xab   : > { %v877_v43 = vadd.f32 %v876_v36, %v862_v35 }
  0xaf   : > { %v890_v37 = vpop.f32.mrf.mxu2 }
  0xb0   : > { %v864_v38 = vpop.f32.mrf.mxu0  ;;  %v891_v45 = vadd.f32 %v890_v37, %v877_v43 }
  0xb1   : > { %v904_v39 = vpop.f32.mrf.mxu3 }
  0xb2   : > { %v878_v40 = vpop.f32.mrf.mxu1  ;;  %v905_v49 = vadd.f32 %v904_v39, %v891_v45 }
  0xb3   : > { %v879_v46 = vadd.f32 %v878_v40, %v864_v38 }
  0xb7   : > { %v892_v41 = vpop.f32.mrf.mxu2 }
  0xb8   : > { %v893_v50 = vadd.f32 %v892_v41, %v879_v46 }
  0xb9   : > { %v906_v44 = vpop.f32.mrf.mxu3 }
  0xba   : > { %v907_v53 = vadd.f32 %v906_v44, %v893_v50 }
  0xc8   : > { %v918_v42 = vpop.f32.mrf.mxu0 }
  0xc9   : > { %v919_v54 = vadd.f32 %v918_v42, %v905_v49 }
  0xca   : > { %v932_v47 = vpop.f32.mrf.mxu1 }
  0xcb   : > { %v933_v57 = vadd.f32 %v932_v47, %v919_v54 }
  0xcf   : > { %v946_v48 = vpop.f32.mrf.mxu2 }
  0xd0   : > { %v920_v51 = vpop.f32.mrf.mxu0  ;;  %v947_v61 = vadd.f32 %v946_v48, %v933_v57 }
  0xd1   : > { %v960_v52 = vpop.f32.mrf.mxu3  ;;  %v921_v55 = vadd.f32 %v920_v51, %v907_v53 }
  0xd2   : > { %v934_v56 = vpop.f32.mrf.mxu1  ;;  %v961_v0 = vadd.f32 %v960_v52, %v947_v61 }
  0xd3   : > { %v935_v60 = vadd.f32 %v934_v56, %v921_v55 }
  0xd7   : > { %v948_v58 = vpop.f32.mrf.mxu2 }
  0xd8   : > { %v949_v62 = vadd.f32 %v948_v58, %v935_v60 }
  0xd9   : > { %v962_v63 = vpop.f32.mrf.mxu3 }
  0xda   : > { %v963_v1 = vadd.f32 %v962_v63, %v949_v62 }
  0xe8   : > { %v974_v59 = vpop.f32.mrf.mxu0 }
  0xe9   : > { %v975_v3 = vadd.f32 %v974_v59, %v961_v0 }
  0xf0   : > { %v976_v2 = vpop.f32.mrf.mxu0 }
  0xf1   : > { %v977_v4 = vadd.f32 %v976_v2, %v963_v1 }
  0xf3   : > { %v1529_v5 = vpack.c.bf16 %v977_v4, %v975_v3  ;;  %v983_v6 = vadd.f32 %v977_v4, %v975_v3 }
  0xf5   : > { %1530 = vst [vmem:[%s213_s7] sm:$0xff] %v1529_v5   ;;  %v984_v7 = vrot.slane %v983_v6, 4 }
  0xf7   : > { %v985_v8 = vadd.f32 %v984_v7, %v983_v6 }
  0xf9   : > { %v986_v9 = vrot.slane %v985_v8, 2 }
  0xfb   : > { %v987_v10 = vadd.f32 %v986_v9, %v985_v8 }
  0xfd   : > { %v988_v11 = vrot.slane %v987_v10, 1 }
  0xff   : > { %v989_v12 = vadd.f32 %v988_v11, %v987_v10 }
 0x101   : > { %v990_v13 = vmul.f32 0.0625, %v989_v12  ;;  %1002 = vst [vmem:[%s217_s17] sm:$0x1] %v989_v12 }
 0x103   : > { %v991_v14 = vsub.f32 %v975_v3, %v990_v13  ;;  %v992_v15 = vsub.f32 %v977_v4, %v990_v13 }
 0x105   : > { %v993_v16 = vmul.f32 %v991_v14, %v991_v14  ;;  %v994_v17 = vmul.f32 %v992_v15, %v992_v15 }
 0x107   : > { %v995_v18 = vadd.f32 %v994_v17, %v993_v16 }
 0x109   : > { %v996_v19 = vrot.slane %v995_v18, 4 }
 0x10b   : > { %v997_v20 = vadd.f32 %v996_v19, %v995_v18 }
 0x10d   : > { %v998_v21 = vrot.slane %v997_v20, 2 }
 0x10f   : > { %v999_v22 = vadd.f32 %v998_v21, %v997_v20 }
 0x111   : > { %v1000_v23 = vrot.slane %v999_v22, 1 }
 0x113   : > { %v1001_v24 = vadd.f32 %v1000_v23, %v999_v22 }
 0x115   : > { %1003 = vst [vmem:[%s220_s12] sm:$0x1] %v1001_v24 }
 0x116 PF: > { %s15_s15 = sadd.s32 1, %s1546_s15  }
 0x117   : > { %p12_p5 = scmp.ge.s32.totalorder %s15_s15, 4  }
 0x119   :  { %14 = sbr.rel (!%p12_p5) target bundleno = 1 (0x1), region = 82 }

// kernel: causal_conv3d.3
= control target key start
LH: loop header
LB: loop body
LE: loop exit
PB: predicated region body
PF: predicated region fallthrough
CT: control target
= control target key end

     0   :  { %s303_s12 = smov 0   ;;  %s326_s0 = inlined_call_operand.vmem [shape: bf16[32,128], index: 0, kind: input, shape index: {}]   ;;  %s327_s1 = inlined_call_operand.vmem [shape: f32[1,128], index: 1, kind: input, shape index: {}]   ;;  %s328_s2 = inlined_call_operand.vmem [shape: f32[1,128], index: 2, kind: input, shape index: {}]   ;;  %s329_s3 = inlined_call_operand.vmem [shape: f32[32,128], index: 3, kind: output, shape index: {}]  }
   0x1 LB: > { %s250_s13 = sadd.s32 4294967295, %s281_s12   ;;  %p254_p0 = scmp.ge.s32.totalorder %s281_s12, 1  ;;  %s281_s12 = sphi %s303_s12, %s13_s12  }
   0x2   : > { %p138_p1 = scmp.lt.s32.totalorder %s281_s12, 3 }
   0x4   : > { %p139_p2 = pnand %p254_p0, %p138_p1 }
   0x5   : > { %s255_s14 = sshll.u32 (!%p139_p2), %s250_s13, 1 }
   0x6   : > { %142 = sbr.rel (%p139_p2) target bundleno = 25 (0x19), region = 32  ;;  %p163_p3 = scmp.lt.s32.totalorder (!%p139_p2), %s255_s14, 3 }
   0xb   : > { %s331_s14 = smov (!%p163_p3, %s255_s14), 3  ;;  %v273_v0 = vld [vmem:[%s327_s1] ss:$0 sm:$0xff] }
   0xc   : > { %s256_s15 = sshll.u32 %s331_s14, 2  ;;  %v274_v4 = vld [vmem:[%s328_s2] ss:$0 sm:$0xff]  ;;  %s258_s23 = sshll.u32 %s331_s14, 3 }
   0xd   : > { %s166_s18 = scalar_lea.vmem %s326_s0, %s256_s15  ;;  %s172_s26 = scalar_lea.vmem %s329_s3, %s258_s23 }
   0xe   : > { %v262_v1 = vld [vmem:[%s166_s18] sm:$0xff]  }
   0xf   : > { %v263_v2 = vunpack.c.l.bf16 %v262_v1  ;;  %v264_v3 = vunpack.c.h.bf16 %v262_v1 }
  0x11   : > { %v182_v5 = vmul.f32 %v273_v0, %v263_v2  ;;  %v183_v6 = vmul.f32 %v273_v0, %v264_v3 }
  0x13   : > { %v188_v7 = vadd.f32 %v274_v4, %v182_v5  ;;  %v189_v8 = vadd.f32 %v274_v4, %v183_v6 }
  0x15   : > { %v190_v9 = vmax.f32 %v188_v7, 0.0  ;;  %v191_v10 = vmax.f32 %v189_v8, 0.0 }
  0x17   : > { %192 = vst [vmem:[%s172_s26] sm:$0xff] %v190_v9 }
  0x18   : > { %193 = vst [vmem:[%s172_s26 + $0x8] sm:$0xff] %v191_v10 }
  0x19 PF: > { %s13_s12 = sadd.s32 1, %s281_s12  }
  0x1a   : > { %p10_p4 = scmp.ge.s32.totalorder %s13_s12, 4  }
  0x1c   :  { %12 = sbr.rel (!%p10_p4) target bundleno = 1 (0x1), region = 62 }

</bundles_post_ra>
